<compile_context>
chip_gen: v7x
topology: tpu7x:2x2x1
jax: 0.10.0
libtpu: 0.0.40
codegen_flags: <defaults>
</compile_context>

<pallas_src>
import functools

import jax
import jax.numpy as jnp
from jax.experimental import pallas as pl
from jax.experimental.pallas import tpu as pltpu

_LANES = 128
_MIB = 1024 * 1024


def _cdiv(a, b):
    return -(-a // b)


def _round_up(v, m):
    return _cdiv(v, m) * m


@functools.lru_cache(maxsize=None)
def _tpu_info():
    """Best-effort (num_tensorcores_per_chip, per-core VMEM bytes)."""
    vmem = 64 * _MIB          # conservative default (v7x per-TC VMEM)
    cores = 1
    try:
        info = pltpu.get_tpu_info()
        for name in ("vmem_capacity_bytes", "vmem_size_bytes", "vmem_bytes"):
            v = getattr(info, name, None)
            if isinstance(v, int) and v > 0:
                vmem = v
                break
        for name in ("num_cores", "tensorcores_per_chip", "num_tensorcores",
                     "cores_per_chip", "core_count"):
            v = getattr(info, name, None)
            if isinstance(v, int) and v > 0:
                cores = v
                break
    except Exception:
        pass
    if cores == 1:
        try:
            if "v7" in jax.devices()[0].device_kind.lower():
                cores = 2      # v7x: 2 TensorCores per chip
        except Exception:
            pass
    return max(1, min(cores, 2)), vmem


def _stlu_kernel(x_ref, o_ref):
    # 50*sigmoid(x) - 25 == 25*tanh(x/2) exactly; tanh is a single EUP op
    # (sigmoid lowers to exp + add + reciprocal).  Compute in f32 so the same
    # kernel is valid on v5e (no bf16 VPU/EUP); the op stays HBM-bound, so the
    # up-cast costs nothing on v6e/v7x either.  HBM I/O stays in input dtype.
    x = x_ref[...].astype(jnp.float32)
    o_ref[...] = (25.0 * jnp.tanh(0.5 * x)).astype(o_ref.dtype)


def _stlu_slab(x2d, block_rows, donate_input):
    """Run the StLU kernel over a lane-dense (rows, 128) slab."""
    rows = x2d.shape[0]
    itemsize = jnp.dtype(x2d.dtype).itemsize
    # Native sublane pack width: 8 rows for 32-bit, 16 for bf16, 32 for 8-bit,
    # so every block boundary lands on a full packed sublane (unmasked vst).
    pack = max(8, 32 // itemsize)
    num_cores, vmem_cap = _tpu_info()

    # ~48 MiB scoped VMEM is safe on all generations (v7x: 64 MiB physical per
    # TC; v5e/v6e: 128 MiB) and comfortably holds the double-buffered tiles.
    vmem_limit = min(48 * _MIB, (3 * vmem_cap) // 4)

    if block_rows is None:
        # ~6 MiB tiles: per-step DMA time >> ~0.35 us grid-step overhead on
        # v5e/v6e/v7x, while 4 double-buffered tiles (in+out) stay ~24 MiB.
        target_bytes = min(6 * _MIB, vmem_limit // 5)
        block_rows = max(pack,
                         (target_bytes // (_LANES * itemsize)) // pack * pack)
    else:
        block_rows = max(pack, _round_up(block_rows, pack))
    if block_rows >= rows:
        block_rows = rows          # single full-extent block (always legal)
    grid_rows = _cdiv(rows, block_rows)

    # Multi-TensorCore split: only when the chip really has 2 TCs (v7x).  Give
    # each core >= 2 steps (so DMA/compute still overlap per core) and keep the
    # grid a multiple of the core count, but never shrink blocks below ~1 MiB.
    # On 1-TC chips extra grid steps are pure serial overhead, so do nothing.
    if num_cores >= 2 and rows > pack:
        min_rows = max(pack, ((1 * _MIB) // (_LANES * itemsize)) // pack * pack)
        desired = 2 * num_cores
        if grid_rows < desired and rows >= desired * min_rows:
            block_rows = _round_up(_cdiv(rows, desired), pack)
            grid_rows = _cdiv(rows, block_rows)
        elif grid_rows % num_cores and grid_rows > 1:
            even = _round_up(grid_rows, num_cores)
            cand = _round_up(_cdiv(rows, even), pack)
            if cand >= min_rows:
                block_rows = cand
                grid_rows = _cdiv(rows, cand)

    n_elems = rows * _LANES
    cost = pl.CostEstimate(
        flops=2 * n_elems,
        transcendentals=n_elems,
        bytes_accessed=2 * n_elems * itemsize,
    )

    return pl.pallas_call(
        _stlu_kernel,
        out_shape=jax.ShapeDtypeStruct((rows, _LANES), x2d.dtype),
        grid_spec=pltpu.PrefetchScalarGridSpec(
            num_scalar_prefetch=0,
            grid=(grid_rows,),
            in_specs=[pl.BlockSpec((block_rows, _LANES), lambda i: (i, 0))],
            out_specs=pl.BlockSpec((block_rows, _LANES), lambda i: (i, 0)),
        ),
        # TODO(synk): confirm a 1-D "parallel" grid is sharded across both v7x
        # TensorCores; if not, switch this axis to pltpu.CORE_PARALLEL.
        compiler_params=pltpu.CompilerParams(
            dimension_semantics=("parallel",),
            vmem_limit_bytes=vmem_limit,
        ),
        cost_estimate=cost,
        input_output_aliases=({0: 0} if donate_input else {}),
    )(x2d)


@functools.partial(jax.jit, static_argnames=("block_rows", "donate_input"))
def stlu(x, *, block_rows=None, donate_input=False):
    """Elementwise StLU (= 50*sigmoid(x) - 25) via a Pallas TPU kernel.

    Accepts any shape / floating dtype; result has the same shape and dtype.
    The whole wrapper is jitted so the ravel/reshape around pallas_call stay
    bitcasts instead of separate dispatches.  donate_input=True aliases the
    kernel's input buffer into its output -- only set it when the caller's
    buffer is genuinely dead after this call.
    """
    orig_shape, orig_dtype = x.shape, x.dtype
    n = x.size
    if n == 0:
        return x

    flat = jnp.ravel(x)
    n_head = (n // _LANES) * _LANES

    if n_head == 0:
        # Tiny ragged input (< 128 elements): a kernel dispatch isn't worth it.
        y = 25.0 * jnp.tanh(0.5 * flat.astype(jnp.float32))
        return y.astype(orig_dtype).reshape(orig_shape)

    if n_head == n:
        # Common path: size % 128 == 0 -> pure (zero-copy) reshape to a
        # lane-dense slab, 1x HBM traffic end to end.
        out = _stlu_slab(flat.reshape(-1, _LANES), block_rows, donate_input)
        return out.reshape(orig_shape)

    # Ragged path: 128-aligned prefix through the kernel, <128-element tail
    # through plain XLA (replaces the old pad->kernel->slice, ~3x HBM traffic).
    # TODO(synk): fold the tail into the kernel's last block with a masked
    # store so this path becomes fully single-pass.
    head = _stlu_slab(flat[:n_head].reshape(-1, _LANES), block_rows,
                      donate_input)
    tail = (25.0 * jnp.tanh(0.5 * flat[n_head:].astype(jnp.float32))
            ).astype(orig_dtype)
    return jnp.concatenate([head.reshape(-1), tail]).reshape(orig_shape)


def _stlu_ref(x):
    return 50.0 * jax.nn.sigmoid(x.astype(jnp.float32)) - 25.0


if __name__ == "__main__":
    # Primary test: NCHW f32 input, size divisible by 128 (zero-copy path).
    x = jax.random.normal(jax.random.PRNGKey(0), (2, 4, 16, 16),
                          dtype=jnp.float32)
    y = jax.block_until_ready(stlu(x))
    assert y.shape == x.shape and y.dtype == x.dtype
    assert jnp.allclose(y, _stlu_ref(x), atol=1e-4, rtol=1e-5)

    # Ragged size large enough to exercise kernel-head + XLA-tail split.
    x2 = jax.random.normal(jax.random.PRNGKey(1), (3, 5, 100),
                           dtype=jnp.float32)
    y2 = jax.block_until_ready(stlu(x2))
    assert y2.shape == x2.shape and y2.dtype == x2.dtype
    assert jnp.allclose(y2, _stlu_ref(x2), atol=1e-4, rtol=1e-5)

    # Tiny ragged size (< 128 elements): pure-XLA fallback path.
    x3 = jax.random.normal(jax.random.PRNGKey(2), (3, 5, 7), dtype=jnp.float32)
    y3 = jax.block_until_ready(stlu(x3))
    assert y3.shape == x3.shape and y3.dtype == x3.dtype
    assert jnp.allclose(y3, _stlu_ref(x3), atol=1e-4, rtol=1e-5)

    # Partial last block: rows=24 with block_rows=16 (rows % block != 0).
    x4 = jax.random.normal(jax.random.PRNGKey(3), (3, 8, 128),
                           dtype=jnp.float32)
    y4 = jax.block_until_ready(stlu(x4, block_rows=16))
    assert y4.shape == x4.shape and y4.dtype == x4.dtype
    assert jnp.allclose(y4, _stlu_ref(x4), atol=1e-4, rtol=1e-5)

    # bf16 input: bf16 HBM I/O, f32 in-kernel compute.
    x5 = jax.random.normal(jax.random.PRNGKey(4), (2, 4, 16, 16),
                           dtype=jnp.bfloat16)
    y5 = jax.block_until_ready(stlu(x5))
    y5_ref = _stlu_ref(x5).astype(jnp.bfloat16)
    assert y5.shape == x5.shape and y5.dtype == jnp.bfloat16
    assert jnp.allclose(y5.astype(jnp.float32), y5_ref.astype(jnp.float32),
                        atol=0.5)

    print("KERNEL_OK")
</pallas_src>

<mosaic_0001>
module attributes {stable_mosaic.version = 11 : i64} {
  func.func @_stlu_kernel(%arg0: i32, %arg1: memref<16x128xf32, #tpu.memory_space<vmem>>, %arg2: memref<16x128xf32, #tpu.memory_space<vmem>>) attributes {dimension_semantics = [#tpu.dimension_semantics<parallel>], iteration_bounds = array<i64: 1>, scalar_prefetch = 0 : i64, scratch_operands = 0 : i64, tpu.core_type = #tpu.core_type<tc>, window_params = [{transform_indices = @transform_0, window_bounds = array<i64: 16, 128>}, {transform_indices = @transform_1, window_bounds = array<i64: 16, 128>}]} {
    %c0 = arith.constant 0 : index
    %c0_0 = arith.constant 0 : index
    %0 = vector.load %arg1[%c0, %c0_0] : memref<16x128xf32, #tpu.memory_space<vmem>>, vector<16x128xf32>
    %cst = arith.constant 5.000000e-01 : f32
    %1 = vector.broadcast %cst : f32 to vector<16x128xf32>
    %2 = arith.mulf %1, %0 : vector<16x128xf32>
    %3 = math.tanh %2 : vector<16x128xf32>
    %cst_1 = arith.constant 2.500000e+01 : f32
    %4 = vector.broadcast %cst_1 : f32 to vector<16x128xf32>
    %5 = arith.mulf %4, %3 : vector<16x128xf32>
    %c0_2 = arith.constant 0 : index
    %c0_3 = arith.constant 0 : index
    %6 = vector.load %arg2[%c0_2, %c0_3] : memref<16x128xf32, #tpu.memory_space<vmem>>, vector<16x128xf32>
    tpu.vector_store %arg2[%c0_2, %c0_3], %5 {strides = array<i32>} : memref<16x128xf32, #tpu.memory_space<vmem>>, vector<16x128xf32>,
    return
  }
  func.func @transform_0(%arg0: i32) -> (i32, i32) {
    %c0_i32 = arith.constant 0 : i32
    %c0_i32_0 = arith.constant 0 : i32
    return %arg0, %c0_i32 : i32, i32
  }
  func.func @transform_1(%arg0: i32) -> (i32, i32) {
    %c0_i32 = arith.constant 0 : i32
    %c0_i32_0 = arith.constant 0 : i32
    return %arg0, %c0_i32 : i32, i32
  }
}

</mosaic_0001>

<bundles_post_ra>
// kernel: stlu.1
= control target key start
LH: loop header
LB: loop body
LE: loop exit
PB: predicated region body
PF: predicated region fallthrough
CT: control target
= control target key end

     0   :  { %s48_s0 = inlined_call_operand.vmem [shape: f32[16,128], index: 0, kind: input, shape index: {}]   ;;  %s49_s1 = inlined_call_operand.vmem [shape: f32[16,128], index: 1, kind: output, shape index: {}]  }
   0x1   :  { %v8_v0 = vld [vmem:[%s48_s0] sm:$0xff]  ;;  %v9_v1 = vld [vmem:[%s48_s0 + $0x8] sm:$0xff] }
   0x2   :  { %v10_v2 = vmul.f32 0.5, %v8_v0  ;;  %v11_v3 = vmul.f32 0.5, %v9_v1 }
   0x4   :  { %22 = vtanh.f32 %v10_v2 }
   0x5   :  { %24 = vtanh.f32 %v11_v3 }
   0xe   :  { %v23_v4 = vpop.eup %22 }
   0xf   :  { %v25_v5 = vpop.eup %24  ;;  %v14_v6 = vmul.f32 25.0, %v23_v4 }
  0x10   :  { %v15_v7 = vmul.f32 25.0, %v25_v5 }
  0x11   :  { %16 = vst [vmem:[%s49_s1] sm:$0xff] %v14_v6 }
  0x12   :  { %17 = vst [vmem:[%s49_s1 + $0x8] sm:$0xff] %v15_v7 }

</bundles_post_ra>
